<compile_context>
chip_gen: v5e
topology: v5e:2x2
jax: 0.10.0
libtpu: 0.0.40
codegen_flags: <defaults>
</compile_context>

<pallas_src>
import numpy as np

import jax
import jax.numpy as jnp
from jax import lax
from jax.experimental import pallas as pl
from jax.experimental.pallas import tpu as pltpu

EPS = 1e-6


def _round_up(x, m):
    return ((x + m - 1) // m) * m


def _pick_tile(n, d_pad, f_pad):
    """Square tile edge: large for arithmetic intensity, VMEM-safe on v7x."""
    if n <= 128:
        tile = 128
    elif n <= 1024:
        tile = 256
    else:
        tile = 512
    # Budget: 4 double-buffered bf16 streamed blocks + ~4 live (T,T) f32
    # epilogue temporaries, kept under ~40 MiB (v7x has 64 MiB VMEM per TC).
    while tile > 128 and (8 * tile * (d_pad + f_pad) + 16 * tile * tile) > 40 * 1024 * 1024:
        tile //= 2
    return tile


def graphsim_kernel(bi_ref, bj_ref, wt_ref,
                    hg_i_ref, hg_j_ref, fp_i_ref, fp_j_ref,
                    cnt_i_ref, cnt_j_ref, inv_i_ref, inv_j_ref,
                    acc_ref):
    """One upper-triangular (T, T) tile; accumulates wt * sum((cos - tani)^2)."""
    p = pl.program_id(0)          # triangle half (parallel / megacore axis)
    t = pl.program_id(1)          # tile-pair step within this half (reduction)

    @pl.when(t == 0)
    def _init():
        acc_ref[...] = jnp.zeros_like(acc_ref)

    idx = p * pl.num_programs(1) + t
    wt_i = wt_ref[idx]            # 1 = diagonal tile, 2 = off-diagonal, 0 = pad

    @pl.when(wt_i > 0)
    def _compute():
        # Tanimoto gram: c = fp_i @ fp_j.T (MXU native rhs-transposed form;
        # bf16 exact for 0/1 fingerprints, f32 accumulation).
        c = lax.dot_general(
            fp_i_ref[...], fp_j_ref[...],
            dimension_numbers=(((1,), (1,)), ((), ())),
            preferred_element_type=jnp.float32)                 # (T, T)
        tani_den = cnt_i_ref[...] + cnt_j_ref[...] - c          # (T,1)+(1,T)-(T,T)

        # Cosine gram: g = hg_i @ hg_j.T; inverse norms hoisted to the wrapper.
        g = lax.dot_general(
            hg_i_ref[...], hg_j_ref[...],
            dimension_numbers=(((1,), (1,)), ((), ())),
            preferred_element_type=jnp.float32)                 # (T, T)

        # Fused epilogue: d = sim_cos - sim_fp without materializing either.
        d = (g * inv_i_ref[...]) * inv_j_ref[...] \
            - c * pl.reciprocal(tani_den, approx=True)          # EUP reciprocal

        row = jnp.sum(d * d, axis=1, keepdims=True)             # (T, 1)
        acc_ref[...] += wt_i.astype(jnp.float32) * jnp.sum(row, axis=0,
                                                           keepdims=True)


@jax.jit
def graphsim_loss(h_g, fp):
    N, D = h_g.shape
    _, F = fp.shape

    D_pad = _round_up(D, 128)
    F_pad = _round_up(F, 128)
    TILE = _pick_tile(N, D_pad, F_pad)
    N_pad = _round_up(N, TILE)

    # bf16 MXU feed (exact for binary fingerprints, ~1e-3 relative for h_g);
    # zero-pad to lane-dense, tile-aligned shapes.  Padded rows contribute
    # exactly 0 to the loss sum.
    hg_p = jnp.pad(h_g.astype(jnp.bfloat16), ((0, N_pad - N), (0, D_pad - D)))
    fp_p = jnp.pad(fp.astype(jnp.bfloat16), ((0, N_pad - N), (0, F_pad - F)))

    # Hoisted per-row statistics (computed once, streamed as small vectors).
    sq = jnp.sum(hg_p.astype(jnp.float32) ** 2, axis=1, keepdims=True)   # (N_pad,1)
    # Clamp BEFORE rsqrt: zero(-padded) rows -> finite inverse norm.
    # (Per-factor clamp == torch's product clamp unless a norm < eps.)
    inv = lax.rsqrt(jnp.maximum(sq, EPS * EPS))                          # 1/max(||x||,eps)
    cnt = jnp.sum(fp_p.astype(jnp.float32), axis=1, keepdims=True)       # (N_pad,1)
    cnt = jnp.where(cnt < EPS, EPS, cnt)                                 # cnt[cnt<eps]=eps

    cnt_col, cnt_row = cnt, cnt.reshape(1, N_pad)
    inv_col, inv_row = inv, inv.reshape(1, N_pad)

    # Upper-triangular tile pairs, split into two balanced halves (megacore).
    Gi = N_pad // TILE
    pairs = [(i, j) for i in range(Gi) for j in range(i, Gi)]
    T = len(pairs)
    T_half = (T + 1) // 2
    total = 2 * T_half
    bi_np = np.zeros(total, np.int32)
    bj_np = np.zeros(total, np.int32)
    wt_np = np.zeros(total, np.int32)
    for k in range(total):
        if k < T:
            i, j = pairs[k]
            bi_np[k], bj_np[k], wt_np[k] = i, j, (1 if i == j else 2)
        else:  # padding of the shorter half: repeat last pair with weight 0
            i, j = pairs[T - 1]
            bi_np[k], bj_np[k], wt_np[k] = i, j, 0
    bi_tbl = jnp.asarray(bi_np)
    bj_tbl = jnp.asarray(bj_np)
    wt_tbl = jnp.asarray(wt_np)

    # index_maps receive (grid indices..., *scalar-prefetch refs) positionally.
    def row_map(p, t, bi, bj, wt):
        return (bi[p * T_half + t], 0)

    def col_map(p, t, bi, bj, wt):
        return (bj[p * T_half + t], 0)

    def colvec_map(p, t, bi, bj, wt):
        return (0, bj[p * T_half + t])

    def out_map(p, t, bi, bj, wt):
        return (p, 0, 0)

    # Only raise the scoped VMEM limit when the working set actually needs it
    # (keeps small problems on the conservative default; safe on 64 MiB v7x).
    est_vmem = 8 * TILE * (D_pad + F_pad) + 16 * TILE * TILE
    cp_kwargs = dict(dimension_semantics=("parallel", "arbitrary"))
    if est_vmem > 12 * 1024 * 1024:
        cp_kwargs["vmem_limit_bytes"] = 48 * 1024 * 1024

    partial = pl.pallas_call(
        graphsim_kernel,
        out_shape=jax.ShapeDtypeStruct((2, 1, 1), jnp.float32),
        grid_spec=pltpu.PrefetchScalarGridSpec(
            num_scalar_prefetch=3,
            grid=(2, T_half),
            in_specs=[
                pl.BlockSpec((TILE, D_pad), row_map),     # h_g row block
                pl.BlockSpec((TILE, D_pad), col_map),     # h_g col block
                pl.BlockSpec((TILE, F_pad), row_map),     # fp  row block
                pl.BlockSpec((TILE, F_pad), col_map),     # fp  col block
                pl.BlockSpec((TILE, 1), row_map),         # cnt_i
                pl.BlockSpec((1, TILE), colvec_map),      # cnt_j
                pl.BlockSpec((TILE, 1), row_map),         # inv_norm_i
                pl.BlockSpec((1, TILE), colvec_map),      # inv_norm_j
            ],
            out_specs=pl.BlockSpec((None, 1, 1), out_map),
        ),
        compiler_params=pltpu.CompilerParams(**cp_kwargs),
    )(bi_tbl, bj_tbl, wt_tbl, hg_p, hg_p, fp_p, fp_p,
      cnt_col, cnt_row, inv_col, inv_row)

    # Diagonal tiles counted once, off-diagonal tiles twice (symmetry); padded
    # rows/cols contribute exactly 0, so divide by the real N*N.
    return jnp.sum(partial) / (N * N)


def graphsim_ref(h_g, fp, eps=EPS):
    """Pure-JAX mirror of the PyTorch GraphSim.forward."""
    c = fp @ fp.T
    cnt = fp.sum(axis=1)
    cnt = jnp.where(cnt < eps, eps, cnt)
    sim_fp = c / (cnt[None, :] + cnt[:, None] - c)
    nrm = jnp.sqrt(jnp.sum(h_g * h_g, axis=1))
    denom = jnp.maximum(nrm[:, None] * nrm[None, :], eps)
    sim_cos = (h_g @ h_g.T) / denom
    return jnp.mean((sim_cos - sim_fp) ** 2)


if __name__ == "__main__":
    N, D, F = 8, 32, 64   # N graphs, hidden dim D, fingerprint length F

    key = jax.random.PRNGKey(0)
    k_hg, k_fp = jax.random.split(key)
    h_g = jax.random.normal(k_hg, (N, D), dtype=jnp.float32)
    fp = jax.random.bernoulli(k_fp, p=0.3, shape=(N, F)).astype(jnp.float32)

    loss = jax.block_until_ready(graphsim_loss(h_g, fp))

    # Tight check vs. a reference on the same bf16-quantized h_g (covers the
    # approx reciprocal), loose check vs. the full-fp32 reference (covers the
    # bf16 input quantization of h_g).
    ref_q = graphsim_ref(h_g.astype(jnp.bfloat16).astype(jnp.float32), fp)
    ref_f32 = graphsim_ref(h_g, fp)
    assert bool(jnp.isfinite(loss)), loss
    assert jnp.allclose(loss, ref_q, rtol=2e-2, atol=1e-5), (loss, ref_q)
    assert jnp.allclose(loss, ref_f32, rtol=5e-2, atol=1e-3), (loss, ref_f32)

    print("KERNEL_OK")
</pallas_src>

<mosaic_0001>
module attributes {stable_mosaic.version = 11 : i64} {
  func.func @graphsim_kernel(%arg0: i32, %arg1: i32, %arg2: memref<2xi32, #tpu.memory_space<smem>>, %arg3: memref<2xi32, #tpu.memory_space<smem>>, %arg4: memref<2xi32, #tpu.memory_space<smem>>, %arg5: memref<128x128xbf16, #tpu.memory_space<vmem>>, %arg6: memref<128x128xbf16, #tpu.memory_space<vmem>>, %arg7: memref<128x128xbf16, #tpu.memory_space<vmem>>, %arg8: memref<128x128xbf16, #tpu.memory_space<vmem>>, %arg9: memref<128x1xf32, #tpu.memory_space<vmem>>, %arg10: memref<1x128xf32, #tpu.memory_space<vmem>>, %arg11: memref<128x1xf32, #tpu.memory_space<vmem>>, %arg12: memref<1x128xf32, #tpu.memory_space<vmem>>, %arg13: memref<1x1x1xf32, #tpu.memory_space<vmem>>) attributes {dimension_semantics = [#tpu.dimension_semantics<parallel>, #tpu.dimension_semantics<arbitrary>], iteration_bounds = array<i64: 2, 1>, scalar_prefetch = 3 : i64, scratch_operands = 0 : i64, tpu.core_type = #tpu.core_type<tc>, window_params = [{transform_indices = @transform_0, window_bounds = array<i64: 128, 128>}, {transform_indices = @transform_1, window_bounds = array<i64: 128, 128>}, {transform_indices = @transform_2, window_bounds = array<i64: 128, 128>}, {transform_indices = @transform_3, window_bounds = array<i64: 128, 128>}, {transform_indices = @transform_4, window_bounds = array<i64: 128, 1>}, {transform_indices = @transform_5, window_bounds = array<i64: 1, 128>}, {transform_indices = @transform_6, window_bounds = array<i64: 128, 1>}, {transform_indices = @transform_7, window_bounds = array<i64: 1, 128>}, {transform_indices = @transform_8, window_bounds = array<i64: 1, 1, 1>}]} {
    %c0_i32 = arith.constant 0 : i32
    %0 = arith.cmpi eq, %arg1, %c0_i32 : i32
    %1 = arith.extui %0 : i1 to i32
    %c0_i32_0 = arith.constant 0 : i32
    %2 = arith.cmpi ne, %1, %c0_i32_0 : i32
    scf.if %2 {
      %cst = arith.constant 0.000000e+00 : f32
      %10 = vector.broadcast %cst : f32 to vector<1x1xf32>
      %c0 = arith.constant 0 : index
      %c0_3 = arith.constant 0 : index
      %c0_4 = arith.constant 0 : index
      %11 = vector.load %arg13[%c0, %c0_3, %c0_4] : memref<1x1x1xf32, #tpu.memory_space<vmem>>, vector<1x1x1xf32>
      %12 = vector.shape_cast %11 : vector<1x1x1xf32> to vector<1x1xf32>
      %13 = vector.shape_cast %10 : vector<1x1xf32> to vector<1x1x1xf32>
      tpu.vector_store %arg13[%c0, %c0_3, %c0_4], %13 {strides = array<i32>} : memref<1x1x1xf32, #tpu.memory_space<vmem>>, vector<1x1x1xf32>,
    } else {
    }
    %c1_i32 = arith.constant 1 : i32
    %3 = arith.muli %arg0, %c1_i32 : i32
    %4 = arith.addi %3, %arg1 : i32
    %5 = arith.index_cast %4 : i32 to index
    %6 = memref.load %arg4[%5] : memref<2xi32, #tpu.memory_space<smem>>
    %c0_i32_1 = arith.constant 0 : i32
    %7 = arith.cmpi sgt, %6, %c0_i32_1 : i32
    %8 = arith.extui %7 : i1 to i32
    %c0_i32_2 = arith.constant 0 : i32
    %9 = arith.cmpi ne, %8, %c0_i32_2 : i32
    scf.if %9 {
      %c0 = arith.constant 0 : index
      %c0_3 = arith.constant 0 : index
      %10 = vector.load %arg7[%c0, %c0_3] : memref<128x128xbf16, #tpu.memory_space<vmem>>, vector<128x128xbf16>
      %c0_4 = arith.constant 0 : index
      %c0_5 = arith.constant 0 : index
      %11 = vector.load %arg8[%c0_4, %c0_5] : memref<128x128xbf16, #tpu.memory_space<vmem>>, vector<128x128xbf16>
      %cst = arith.constant dense<0.000000e+00> : vector<128x128xf32>
      %12 = tpu.matmul %10, %11, %cst {dimension_numbers = #tpu.dot_dimension_numbers<[1], [1], [0], [0], [0, 0, 1, 0], [], []>} : vector<128x128xbf16>, vector<128x128xbf16>, vector<128x128xf32> -> vector<128x128xf32>
      %c0_6 = arith.constant 0 : index
      %c0_7 = arith.constant 0 : index
      %13 = vector.load %arg9[%c0_6, %c0_7] : memref<128x1xf32, #tpu.memory_space<vmem>>, vector<128x1xf32>
      %c0_8 = arith.constant 0 : index
      %c0_9 = arith.constant 0 : index
      %14 = vector.load %arg10[%c0_8, %c0_9] : memref<1x128xf32, #tpu.memory_space<vmem>>, vector<1x128xf32>
      %15 = vector.broadcast %13 : vector<128x1xf32> to vector<128x128xf32>
      %16 = vector.broadcast %14 : vector<1x128xf32> to vector<128x128xf32>
      %17 = arith.addf %15, %16 : vector<128x128xf32>
      %18 = arith.subf %17, %12 : vector<128x128xf32>
      %c0_10 = arith.constant 0 : index
      %c0_11 = arith.constant 0 : index
      %19 = vector.load %arg5[%c0_10, %c0_11] : memref<128x128xbf16, #tpu.memory_space<vmem>>, vector<128x128xbf16>
      %c0_12 = arith.constant 0 : index
      %c0_13 = arith.constant 0 : index
      %20 = vector.load %arg6[%c0_12, %c0_13] : memref<128x128xbf16, #tpu.memory_space<vmem>>, vector<128x128xbf16>
      %cst_14 = arith.constant dense<0.000000e+00> : vector<128x128xf32>
      %21 = tpu.matmul %19, %20, %cst_14 {dimension_numbers = #tpu.dot_dimension_numbers<[1], [1], [0], [0], [0, 0, 1, 0], [], []>} : vector<128x128xbf16>, vector<128x128xbf16>, vector<128x128xf32> -> vector<128x128xf32>
      %c0_15 = arith.constant 0 : index
      %c0_16 = arith.constant 0 : index
      %22 = vector.load %arg11[%c0_15, %c0_16] : memref<128x1xf32, #tpu.memory_space<vmem>>, vector<128x1xf32>
      %23 = vector.broadcast %22 : vector<128x1xf32> to vector<128x128xf32>
      %24 = arith.mulf %21, %23 : vector<128x128xf32>
      %c0_17 = arith.constant 0 : index
      %c0_18 = arith.constant 0 : index
      %25 = vector.load %arg12[%c0_17, %c0_18] : memref<1x128xf32, #tpu.memory_space<vmem>>, vector<1x128xf32>
      %26 = vector.broadcast %25 : vector<1x128xf32> to vector<128x128xf32>
      %27 = arith.mulf %24, %26 : vector<128x128xf32>
      %28 = tpu.reciprocal %18 {approx = true} : vector<128x128xf32> -> vector<128x128xf32>
      %29 = arith.mulf %12, %28 : vector<128x128xf32>
      %30 = arith.subf %27, %29 : vector<128x128xf32>
      %31 = arith.mulf %30, %30 : vector<128x128xf32>
      %cst_19 = arith.constant dense<0.000000e+00> : vector<128xf32>
      %32 = vector.multi_reduction <add>, %31, %cst_19 [1] : vector<128x128xf32> to vector<128xf32>
      %33 = vector.shape_cast %32 : vector<128xf32> to vector<128x1xf32>
      %c0_20 = arith.constant 0 : index
      %c0_21 = arith.constant 0 : index
      %c0_22 = arith.constant 0 : index
      %34 = vector.load %arg13[%c0_20, %c0_21, %c0_22] : memref<1x1x1xf32, #tpu.memory_space<vmem>>, vector<1x1x1xf32>
      %35 = vector.shape_cast %34 : vector<1x1x1xf32> to vector<1x1xf32>
      %36 = arith.sitofp %6 : i32 to f32
      %cst_23 = arith.constant dense<0.000000e+00> : vector<1xf32>
      %37 = vector.multi_reduction <add>, %33, %cst_23 [0] : vector<128x1xf32> to vector<1xf32>
      %38 = vector.shape_cast %37 : vector<1xf32> to vector<1x1xf32>
      %39 = vector.broadcast %36 : f32 to vector<1x1xf32>
      %40 = arith.mulf %39, %38 : vector<1x1xf32>
      %41 = arith.addf %35, %40 : vector<1x1xf32>
      %c0_24 = arith.constant 0 : index
      %c0_25 = arith.constant 0 : index
      %c0_26 = arith.constant 0 : index
      %42 = vector.load %arg13[%c0_24, %c0_25, %c0_26] : memref<1x1x1xf32, #tpu.memory_space<vmem>>, vector<1x1x1xf32>
      %43 = vector.shape_cast %42 : vector<1x1x1xf32> to vector<1x1xf32>
      %44 = vector.shape_cast %41 : vector<1x1xf32> to vector<1x1x1xf32>
      tpu.vector_store %arg13[%c0_24, %c0_25, %c0_26], %44 {strides = array<i32>} : memref<1x1x1xf32, #tpu.memory_space<vmem>>, vector<1x1x1xf32>,
    } else {
    }
    return
  }
  func.func @transform_0(%arg0: i32, %arg1: i32, %arg2: memref<2xi32, #tpu.memory_space<smem>>, %arg3: memref<2xi32, #tpu.memory_space<smem>>, %arg4: memref<2xi32, #tpu.memory_space<smem>>) -> (i32, i32) {
    %c1_i32 = arith.constant 1 : i32
    %0 = arith.muli %arg0, %c1_i32 : i32
    %1 = arith.addi %0, %arg1 : i32
    %2 = arith.index_cast %1 : i32 to index
    %3 = memref.load %arg2[%2] : memref<2xi32, #tpu.memory_space<smem>>
    %c0_i32 = arith.constant 0 : i32
    %c0_i32_0 = arith.constant 0 : i32
    return %3, %c0_i32 : i32, i32
  }
  func.func @transform_1(%arg0: i32, %arg1: i32, %arg2: memref<2xi32, #tpu.memory_space<smem>>, %arg3: memref<2xi32, #tpu.memory_space<smem>>, %arg4: memref<2xi32, #tpu.memory_space<smem>>) -> (i32, i32) {
    %c1_i32 = arith.constant 1 : i32
    %0 = arith.muli %arg0, %c1_i32 : i32
    %1 = arith.addi %0, %arg1 : i32
    %2 = arith.index_cast %1 : i32 to index
    %3 = memref.load %arg3[%2] : memref<2xi32, #tpu.memory_space<smem>>
    %c0_i32 = arith.constant 0 : i32
    %c0_i32_0 = arith.constant 0 : i32
    return %3, %c0_i32 : i32, i32
  }
  func.func @transform_2(%arg0: i32, %arg1: i32, %arg2: memref<2xi32, #tpu.memory_space<smem>>, %arg3: memref<2xi32, #tpu.memory_space<smem>>, %arg4: memref<2xi32, #tpu.memory_space<smem>>) -> (i32, i32) {
    %c1_i32 = arith.constant 1 : i32
    %0 = arith.muli %arg0, %c1_i32 : i32
    %1 = arith.addi %0, %arg1 : i32
    %2 = arith.index_cast %1 : i32 to index
    %3 = memref.load %arg2[%2] : memref<2xi32, #tpu.memory_space<smem>>
    %c0_i32 = arith.constant 0 : i32
    %c0_i32_0 = arith.constant 0 : i32
    return %3, %c0_i32 : i32, i32
  }
  func.func @transform_3(%arg0: i32, %arg1: i32, %arg2: memref<2xi32, #tpu.memory_space<smem>>, %arg3: memref<2xi32, #tpu.memory_space<smem>>, %arg4: memref<2xi32, #tpu.memory_space<smem>>) -> (i32, i32) {
    %c1_i32 = arith.constant 1 : i32
    %0 = arith.muli %arg0, %c1_i32 : i32
    %1 = arith.addi %0, %arg1 : i32
    %2 = arith.index_cast %1 : i32 to index
    %3 = memref.load %arg3[%2] : memref<2xi32, #tpu.memory_space<smem>>
    %c0_i32 = arith.constant 0 : i32
    %c0_i32_0 = arith.constant 0 : i32
    return %3, %c0_i32 : i32, i32
  }
  func.func @transform_4(%arg0: i32, %arg1: i32, %arg2: memref<2xi32, #tpu.memory_space<smem>>, %arg3: memref<2xi32, #tpu.memory_space<smem>>, %arg4: memref<2xi32, #tpu.memory_space<smem>>) -> (i32, i32) {
    %c1_i32 = arith.constant 1 : i32
    %0 = arith.muli %arg0, %c1_i32 : i32
    %1 = arith.addi %0, %arg1 : i32
    %2 = arith.index_cast %1 : i32 to index
    %3 = memref.load %arg2[%2] : memref<2xi32, #tpu.memory_space<smem>>
    %c0_i32 = arith.constant 0 : i32
    %c0_i32_0 = arith.constant 0 : i32
    return %3, %c0_i32 : i32, i32
  }
  func.func @transform_5(%arg0: i32, %arg1: i32, %arg2: memref<2xi32, #tpu.memory_space<smem>>, %arg3: memref<2xi32, #tpu.memory_space<smem>>, %arg4: memref<2xi32, #tpu.memory_space<smem>>) -> (i32, i32) {
    %c1_i32 = arith.constant 1 : i32
    %0 = arith.muli %arg0, %c1_i32 : i32
    %1 = arith.addi %0, %arg1 : i32
    %2 = arith.index_cast %1 : i32 to index
    %3 = memref.load %arg3[%2] : memref<2xi32, #tpu.memory_space<smem>>
    %c0_i32 = arith.constant 0 : i32
    %c0_i32_0 = arith.constant 0 : i32
    return %c0_i32, %3 : i32, i32
  }
  func.func @transform_6(%arg0: i32, %arg1: i32, %arg2: memref<2xi32, #tpu.memory_space<smem>>, %arg3: memref<2xi32, #tpu.memory_space<smem>>, %arg4: memref<2xi32, #tpu.memory_space<smem>>) -> (i32, i32) {
    %c1_i32 = arith.constant 1 : i32
    %0 = arith.muli %arg0, %c1_i32 : i32
    %1 = arith.addi %0, %arg1 : i32
    %2 = arith.index_cast %1 : i32 to index
    %3 = memref.load %arg2[%2] : memref<2xi32, #tpu.memory_space<smem>>
    %c0_i32 = arith.constant 0 : i32
    %c0_i32_0 = arith.constant 0 : i32
    return %3, %c0_i32 : i32, i32
  }
  func.func @transform_7(%arg0: i32, %arg1: i32, %arg2: memref<2xi32, #tpu.memory_space<smem>>, %arg3: memref<2xi32, #tpu.memory_space<smem>>, %arg4: memref<2xi32, #tpu.memory_space<smem>>) -> (i32, i32) {
    %c1_i32 = arith.constant 1 : i32
    %0 = arith.muli %arg0, %c1_i32 : i32
    %1 = arith.addi %0, %arg1 : i32
    %2 = arith.index_cast %1 : i32 to index
    %3 = memref.load %arg3[%2] : memref<2xi32, #tpu.memory_space<smem>>
    %c0_i32 = arith.constant 0 : i32
    %c0_i32_0 = arith.constant 0 : i32
    return %c0_i32, %3 : i32, i32
  }
  func.func @transform_8(%arg0: i32, %arg1: i32, %arg2: memref<2xi32, #tpu.memory_space<smem>>, %arg3: memref<2xi32, #tpu.memory_space<smem>>, %arg4: memref<2xi32, #tpu.memory_space<smem>>) -> (i32, i32, i32) {
    %c0_i32 = arith.constant 0 : i32
    %c0_i32_0 = arith.constant 0 : i32
    %c0_i32_1 = arith.constant 0 : i32
    return %arg0, %c0_i32, %c0_i32_0 : i32, i32, i32
  }
}

</mosaic_0001>

<bundles_post_ra>
// kernel: graphsim_loss.1
= control target key start
LH: loop header
LB: loop body
LE: loop exit
PB: predicated region body
PF: predicated region fallthrough
CT: control target
= control target key end

     0   :  { %s1798_s23 = smov [#allocation3]   ;;  %s1799_s24 = smov [#allocation4]   ;;  %s2161_s0 = inlined_call_operand.vmem [shape: s32[2], index: 0, kind: input, shape index: {}, may-alias: {0,1}]   ;;  %s2162_s3 = inlined_call_operand.vmem [shape: bf16[128,128], index: 3, kind: input, shape index: {}, may-alias: {3,4}]   ;;  %s2163_s4 = inlined_call_operand.vmem [shape: bf16[128,128], index: 4, kind: input, shape index: {}, may-alias: {3,4}]   ;;  %s2164_s5 = inlined_call_operand.vmem [shape: bf16[128,128], index: 5, kind: input, shape index: {}, may-alias: {5,6}]   ;;  %s2165_s6 = inlined_call_operand.vmem [shape: bf16[128,128], index: 6, kind: input, shape index: {}, may-alias: {5,6}]   ;;  %s2166_s7 = inlined_call_operand.vmem [shape: f32[128,1], index: 7, kind: input, shape index: {}]   ;;  %s2167_s8 = inlined_call_operand.vmem [shape: f32[1,128], index: 8, kind: input, shape index: {}]   ;;  %s2168_s9 = inlined_call_operand.vmem [shape: f32[128,1], index: 9, kind: input, shape index: {}]   ;;  %s2169_s10 = inlined_call_operand.vmem [shape: f32[1,128], index: 10, kind: input, shape index: {}]   ;;  %s2170_s11 = inlined_call_operand.vmem [shape: f32[2,1,1], index: 11, kind: output, shape index: {}]   ;;  %s2171_s1 = inlined_call_operand.vmem [shape: s32[2], index: 1, kind: input, shape index: {}, may-alias: {0,1}]   ;;  %s2172_s2 = inlined_call_operand.vmem [shape: s32[2], index: 2, kind: input, shape index: {}]  }
   0x1   :  { %s17_s19 = sshll.u32 %s2161_s0, 4  ;;  %s22_s22 = sshll.u32 %s2171_s1, 4  ;;  %s18_s19 = int_to_ptr.vmem [resolvable:$true] %s17_s19  ;;  %s23_s22 = int_to_ptr.vmem [resolvable:$true] %s22_s22 }
   0x2   :  { %20 = dma.vmem_to_smem %s18_s19, 16, %s1798_s23, [#allocation2] }
   0x3   :  { %25 = dma.vmem_to_smem %s23_s22, 16, %s1799_s24, [#allocation2] }
   0x4   :  { %s27_s27 = sshll.u32 %s2172_s2, 4  ;;  %s1800_s28 = smov [#allocation5]   ;;  %s28_s27 = int_to_ptr.vmem [resolvable:$true] %s27_s27 }
   0x5   :  { %30 = dma.vmem_to_smem %s28_s27, 16, %s1800_s28, [#allocation2] }
   0x6   :  { %1784 = dma.done.wait [#allocation2], 48 }
   0x7   :  { %1785 = vsyncadd [#allocation2], 4294967248 }
   0x8   :  { %33 = sfence }
   0x9   :  { %s1872_s0 = smov 0   ;;  %s1874_s29 = smov 0  }
   0xa   :  { %s1876_s1 = smov 0  }
   0xb LB: > { %s51_s2 = sadd.s32 1, %s1792_s29  ;;  %p1478_p0 = scmp.ge.s32.totalorder %s1796_s1, 1  ;;  %s1796_s1 = sphi %s1876_s1, %s39_s1   ;;  %s1792_s29 = sphi %s1874_s29, %s2176_s29   ;;  %s1788_s0 = sphi %s1872_s0, %s2175_s0  }
   0xc   : > { %p53_p1 = scmp.ge.s32.totalorder %s51_s2, 2  ;;  %p431_p2 = scmp.lt.s32.totalorder %s1796_s1, 3 }
   0xe   : > { %s2178_s2 = smov (%p53_p1, %s51_s2), 0  ;;  %p432_p3 = pnand %p1478_p0, %p431_p2 }
   0xf   : > { %2173 = sst [smem:[#allocation7_spill]] %s2178_s2  ;;  %p584_p4 = scmp.lt.s32.totalorder (!%p432_p3), %s1788_s0, 1 }
  0x10   : > { %435 = sbr.rel (%p432_p3) target bundleno = 473 (0x1d9), region = 52  ;;  %s511_s30 = sld [smem:[#allocation3 + %s1788_s0]] (!%p432_p3) }
  0x11   : > { %s521_s12 = sld [smem:[#allocation4 + %s1788_s0]] (!%p432_p3) }
  0x12   : > { %s531_s13 = sld [smem:[#allocation3 + %s1788_s0]] (!%p432_p3) }
  0x13   : > { %s541_s14 = sld [smem:[#allocation4 + %s1788_s0]] (!%p432_p3) }
  0x14   : > { %s551_s15 = sld [smem:[#allocation3 + %s1788_s0]] (!%p432_p3) }
  0x15   : > { %s1898_s16 = sld [smem:[#allocation4 + %s1788_s0]]  ;;  %vm591_vm0 = vcmask 0   ;;  %v1801_v0 = vmov 0.0  }
  0x16   : > { %s1479_s17 = sshll.u32 %s511_s30, 4  ;;  %s1902_s18 = sld [smem:[#allocation3 + %s1788_s0]] }
  0x17   : > { %p513_p5 = scmp.lt.s32.totalorder %s1479_s17, 15  ;;  %s1481_s19 = sshll.u32 %s521_s12, 4 }
  0x18   : > { %p523_p6 = scmp.lt.s32.totalorder %s1481_s19, 15  ;;  %s1483_s20 = sshll.u32 %s531_s13, 4 }
  0x19   : > { %s2180_s17 = smov (!%p513_p5, %s1479_s17), 15  ;;  %p533_p7 = scmp.lt.s32.totalorder %s1483_s20, 15 }
  0x1a   : > { %s2182_s19 = smov (!%p523_p6, %s1481_s19), 15  ;;  %s1480_s21 = sshll.u32 %s2180_s17, 2 }
  0x1b   : > { %s1907_s24 = scalar_lea.vmem %s2162_s3, %s1480_s21  ;;  %s1482_s25 = sshll.u32 %s2182_s19, 2 }
  0x1c   : > { %s1912_s28 = scalar_lea.vmem %s2163_s4, %s1482_s25  ;;  %s1485_s30 = sshll.u32 %s541_s14, 4 }
  0x1d   : > { %s2184_s20 = smov (!%p533_p7, %s1483_s20), 15  ;;  %p543_p8 = scmp.lt.s32.totalorder %s1485_s30, 15 }
  0x1e   : > { %s1487_s12 = sshll.u32 %s551_s15, 4  ;;  %s1484_s13 = sshll.u32 %s2184_s20, 2 }
  0x1f   : > { %p553_p9 = scmp.lt.s32.totalorder %s1487_s12, 15  ;;  %s1917_s21 = scalar_lea.vmem %s2164_s5, %s1484_s13 }
  0x20   : > { %p562_p10 = scmp.lt.s32.totalorder %s1898_s16, 0  ;;  %s2186_s30 = smov (!%p543_p8, %s1485_s30), 15 }
  0x21   : > { %s2188_s12 = smov (!%p553_p9, %s1487_s12), 15  ;;  %s1486_s19 = sshll.u32 %s2186_s30, 2 }
  0x22   : > { %s1489_s14 = sshll.u32 %s1902_s18, 4  ;;  %s1924_s15 = scalar_lea.vmem %s2165_s6, %s1486_s19 }
  0x23   : > { %s1488_s20 = sshll.u32 %s2188_s12, 3  ;;  %p570_p11 = scmp.lt.s32.totalorder %s1489_s14, 15 }
  0x24   : > { %s1929_s2 = scalar_lea.vmem %s2166_s7, %s1488_s20  ;;  %s2190_s16 = smov (!%p562_p10, %s1898_s16), 0 }
  0x25   : > { %s2192_s14 = smov (!%p570_p11, %s1489_s14), 15  ;;  %s564_s18 = scalar_lea.vmem %s2167_s8, %s2190_s16 }
  0x26   : > { %s578_s30 = sld [smem:[#allocation4 + %s1788_s0]]  ;;  %s1490_s17 = sshll.u32 %s2192_s14, 3 }
  0x27   : > { %s1940_s22 = sld [smem:[#allocation5 + %s1788_s0]]  ;;  %s1945_s23 = scalar_lea.vmem %s2168_s9, %s1490_s17 }
  0x28   : > { %s2194_s0 = smov (!%p584_p4, %s1788_s0), 1 }
  0x29   : > { %s1953_s26 = scalar_lea.vmem %s2170_s11, %s2194_s0 }
  0x2a   : > { %592 = vst.msk [vmem:[%s1953_s26] sm:$0x1] %vm591_vm0, %v1801_v0 }
  0x2c   : > { %p579_p12 = scmp.lt.s32.totalorder %s578_s30, 0 }
  0x2d   : > { %p1491_p13 = scmp.le.s32.totalorder %s1940_s22, 0 }
  0x2e   : > { %s2196_s30 = smov (!%p579_p12, %s578_s30), 0 }
  0x2f   : > { %s581_s13 = scalar_lea.vmem %s2169_s10, %s2196_s30  ;;  %598 = sbr.rel (%p1491_p13) target bundleno = 473 (0x1d9), region = 60 }
  0x34   : > { %v778_v1 = vld [vmem:[%s1929_s2 + $0x10] sm:$0xff]  ;;  %v776_v2 = vld [vmem:[%s1929_s2] sm:$0xff]  ;;  %v1637_v3 = vld [vmem:[%s1924_s15 + $0x38] sm:$0xff]  ;;  %v1802_v4 = vmov 0  }
  0x35   : > { %1700 = vset.pattern.permute.xlu1 %v1802_v4  ;;  %1699 = vset.pattern.permute.xlu0 %v1802_v4  ;;  %v1653_v5 = vld [vmem:[%s1912_s28 + $0x38] sm:$0xff]  ;;  %v777_v7 = vld [vmem:[%s1929_s2 + $0x8] sm:$0xff]  ;;  %v780_v8 = vld [vmem:[%s1929_s2 + $0x20] sm:$0xff] }
  0x36   : > { %805 = vperm.xlu1 %1700, %v778_v1   ;;  %795 = vperm.xlu0 %1699, %v776_v2   ;;  %v779_v6 = vld [vmem:[%s1929_s2 + $0x18] sm:$0xff]  ;;  %v1636_v9 = vld [vmem:[%s1924_s15 + $0x30] sm:$0xff]  ;;  %v781_v11 = vld [vmem:[%s1929_s2 + $0x28] sm:$0xff] }
  0x37   : > { %727 = vmatpush.bf16.xpose.msra.mxu0 %v1637_v3  ;;  %1654 = vmatpush.bf16.xpose.msra.mxu2 %v1637_v3  ;;  %v1652_v10 = vld [vmem:[%s1912_s28 + $0x30] sm:$0xff]  ;;  %v783_v12 = vld [vmem:[%s1929_s2 + $0x38] sm:$0xff]  ;;  %v1635_v14 = vld [vmem:[%s1924_s15 + $0x28] sm:$0xff] }
  0x38   : > { %1036 = vmatpush.bf16.xpose.msra.mxu1 %v1653_v5  ;;  %1662 = vmatpush.bf16.xpose.msra.mxu3 %v1653_v5  ;;  %v782_v13 = vld [vmem:[%s1929_s2 + $0x30] sm:$0xff]  ;;  %v1651_v15 = vld [vmem:[%s1912_s28 + $0x28] sm:$0xff]  ;;  %v784_v16 = vld [vmem:[%s1929_s2 + $0x40] sm:$0xff] }
  0x39   : > { %1701 = vset.pattern.permute.xlu2 %v1802_v4  ;;  %v786_v17 = vld [vmem:[%s1929_s2 + $0x50] sm:$0xff]  ;;  %v785_v18 = vld [vmem:[%s1929_s2 + $0x48] sm:$0xff]  ;;  %v1634_v19 = vld [vmem:[%s1924_s15 + $0x20] sm:$0xff] }
  0x3a   : > { %815 = vperm.xlu2 %1701, %v780_v8   ;;  %v1650_v20 = vld [vmem:[%s1912_s28 + $0x20] sm:$0xff]  ;;  %v787_v21 = vld [vmem:[%s1929_s2 + $0x58] sm:$0xff]  ;;  %v789_v22 = vld [vmem:[%s1929_s2 + $0x68] sm:$0xff] }
  0x3b   : > { %v788_v23 = vld [vmem:[%s1929_s2 + $0x60] sm:$0xff]  ;;  %v1633_v24 = vld [vmem:[%s1924_s15 + $0x18] sm:$0xff]  ;;  %v790_v26 = vld [vmem:[%s1929_s2 + $0x70] sm:$0xff] }
  0x3c   : > { %v1649_v25 = vld [vmem:[%s1912_s28 + $0x18] sm:$0xff]  ;;  %v1085_v27 = vld [vmem:[%s1945_s23] sm:$0xff]  ;;  %v1632_v29 = vld [vmem:[%s1924_s15 + $0x10] sm:$0xff] }
  0x3d   : > { %v791_v28 = vld [vmem:[%s1929_s2 + $0x78] sm:$0xff]  ;;  %v1648_v30 = vld [vmem:[%s1912_s28 + $0x10] sm:$0xff]  ;;  %v1086_v31 = vld [vmem:[%s1945_s23 + $0x8] sm:$0xff] }
  0x3e   : > { %810 = vperm.xlu1 %1700, %v779_v6   ;;  %800 = vperm.xlu0 %1699, %v777_v7   ;;  %v1088_v32 = vld [vmem:[%s1945_s23 + $0x18] sm:$0xff]  ;;  %v1087_v33 = vld [vmem:[%s1945_s23 + $0x10] sm:$0xff]  ;;  %v1631_v34 = vld [vmem:[%s1924_s15 + $0x8] sm:$0xff] }
  0x3f   : > { %728 = vmatpush.bf16.xpose.msra.mxu0 %v1636_v9  ;;  %1655 = vmatpush.bf16.xpose.msra.mxu2 %v1636_v9  ;;  %v1647_v35 = vld [vmem:[%s1912_s28 + $0x8] sm:$0xff]  ;;  %v1089_v36 = vld [vmem:[%s1945_s23 + $0x20] sm:$0xff]  ;;  %v1091_v37 = vld [vmem:[%s1945_s23 + $0x30] sm:$0xff] }
  0x40   : > { %1037 = vmatpush.bf16.xpose.msra.mxu1 %v1652_v10  ;;  %1663 = vmatpush.bf16.xpose.msra.mxu3 %v1652_v10  ;;  %v1090_v38 = vld [vmem:[%s1945_s23 + $0x28] sm:$0xff]  ;;  %v1630_v39 = vld [vmem:[%s1924_s15] sm:$0xff]  ;;  %v1092_v41 = vld [vmem:[%s1945_s23 + $0x38] sm:$0xff] }
  0x41   : > { %v1646_v40 = vld [vmem:[%s1912_s28] sm:$0xff]  ;;  %v1094_v44 = vld [vmem:[%s1945_s23 + $0x48] sm:$0xff]  ;;  %v1095_v48 = vld [vmem:[%s1945_s23 + $0x50] sm:$0xff] }
  0x42   : > { %820 = vperm.xlu2 %1701, %v781_v11   ;;  %v1638_v42 = vld [vmem:[%s1907_s24] sm:$0xff]  ;;  %v1096_v50 = vld [vmem:[%s1945_s23 + $0x58] sm:$0xff]  ;;  %v1098_v51 = vld [vmem:[%s1945_s23 + $0x68] sm:$0xff] }
  0x43   : > { %v1642_v43 = vld [vmem:[%s1907_s24 + $0x20] sm:$0xff]  ;;  %v1639_v52 = vld [vmem:[%s1907_s24 + $0x8] sm:$0xff]  ;;  %v1100_v54 = vld [vmem:[%s1945_s23 + $0x78] sm:$0xff] }
  0x44   : > { %v1093_v45 = vld [vmem:[%s1945_s23 + $0x40] sm:$0xff]  ;;  %v1643_v53 = vld [vmem:[%s1907_s24 + $0x28] sm:$0xff]  ;;  %v1099_v55 = vld [vmem:[%s1945_s23 + $0x70] sm:$0xff] }
  0x45   : > { %v1622_v46 = vld [vmem:[%s1917_s21] sm:$0xff]  ;;  %v1623_v56 = vld [vmem:[%s1917_s21 + $0x8] sm:$0xff]  ;;  %v1640_v58 = vld [vmem:[%s1907_s24 + $0x10] sm:$0xff] }
  0x46   : > { %830 = vperm.xlu1 %1700, %v783_v12   ;;  %825 = vperm.xlu0 %1699, %v782_v13   ;;  %v1626_v47 = vld [vmem:[%s1917_s21 + $0x20] sm:$0xff]  ;;  %v1627_v57 = vld [vmem:[%s1917_s21 + $0x28] sm:$0xff]  ;;  %v1644_v59 = vld [vmem:[%s1907_s24 + $0x30] sm:$0xff] }
  0x47   : > { %729 = vmatpush.bf16.xpose.msra.mxu0 %v1635_v14  ;;  %1656 = vmatpush.bf16.xpose.msra.mxu2 %v1635_v14  ;;  %v1097_v49 = vld [vmem:[%s1945_s23 + $0x60] sm:$0xff]  ;;  %v1624_v60 = vld [vmem:[%s1917_s21 + $0x10] sm:$0xff]  ;;  %v1641_v62 = vld [vmem:[%s1907_s24 + $0x18] sm:$0xff] }
  0x48   : > { %1038 = vmatpush.bf16.xpose.msra.mxu1 %v1651_v15  ;;  %1664 = vmatpush.bf16.xpose.msra.mxu3 %v1651_v15  ;;  %v1628_v61 = vld [vmem:[%s1917_s21 + $0x30] sm:$0xff]  ;;  %v1645_v63 = vld [vmem:[%s1907_s24 + $0x38] sm:$0xff]  ;;  %v2035_v5 = vld [vmem:[%s564_s18] ss:$0 sm:$0xff] }
  0x49   : > { %v1625_v0 = vld [vmem:[%s1917_s21 + $0x18] sm:$0xff] }
  0x4a   : > { %835 = vperm.xlu2 %1701, %v784_v16   ;;  %v1629_v1 = vld [vmem:[%s1917_s21 + $0x38] sm:$0xff]  ;;  %s1314_s21 = scvt.s32.f32 %s1940_s22 }
  0x4e   : > { %845 = vperm.xlu1 %1700, %v786_v17   ;;  %840 = vperm.xlu0 %1699, %v785_v18  }
  0x4f   : > { %730 = vmatpush.bf16.xpose.msra.mxu0 %v1634_v19  ;;  %1657 = vmatpush.bf16.xpose.msra.mxu2 %v1634_v19 }
  0x50   : > { %1039 = vmatpush.bf16.xpose.msra.mxu1 %v1650_v20  ;;  %1665 = vmatpush.bf16.xpose.msra.mxu3 %v1650_v20 }
  0x52   : > { %850 = vperm.xlu2 %1701, %v787_v21  }
  0x56   : > { %860 = vperm.xlu1 %1700, %v789_v22   ;;  %855 = vperm.xlu0 %1699, %v788_v23  }
  0x57   : > { %731 = vmatpush.bf16.xpose.msra.mxu0 %v1633_v24  ;;  %1658 = vmatpush.bf16.xpose.msra.mxu2 %v1633_v24 }
  0x58   : > { %1040 = vmatpush.bf16.xpose.msra.mxu1 %v1649_v25  ;;  %1666 = vmatpush.bf16.xpose.msra.mxu3 %v1649_v25 }
  0x5a   : > { %865 = vperm.xlu2 %1701, %v790_v26  }
  0x5e   : > { %1103 = vperm.xlu1 %1700, %v1085_v27   ;;  %870 = vperm.xlu0 %1699, %v791_v28   ;;  %v2065_v28 = vld [vmem:[%s581_s13] ss:$0 sm:$0xff] }
  0x5f   : > { %732 = vmatpush.bf16.xpose.msra.mxu0 %v1632_v29  ;;  %1659 = vmatpush.bf16.xpose.msra.mxu2 %v1632_v29 }
  0x60   : > { %1041 = vmatpush.bf16.xpose.msra.mxu1 %v1648_v30  ;;  %1667 = vmatpush.bf16.xpose.msra.mxu3 %v1648_v30 }
  0x62   : > { %1108 = vperm.xlu2 %1701, %v1086_v31  }
  0x66   : > { %1118 = vperm.xlu1 %1700, %v1088_v32   ;;  %1113 = vperm.xlu0 %1699, %v1087_v33  }
  0x67   : > { %733 = vmatpush.bf16.xpose.msra.mxu0 %v1631_v34  ;;  %1660 = vmatpush.bf16.xpose.msra.mxu2 %v1631_v34 }
  0x68   : > { %1042 = vmatpush.bf16.xpose.msra.mxu1 %v1647_v35  ;;  %1668 = vmatpush.bf16.xpose.msra.mxu3 %v1647_v35 }
  0x6a   : > { %1123 = vperm.xlu2 %1701, %v1089_v36  }
  0x6e   : > { %1133 = vperm.xlu1 %1700, %v1091_v37   ;;  %1128 = vperm.xlu0 %1699, %v1090_v38  }
  0x6f   : > { %734 = vmatpush.bf16.xpose.msra.mxu0 %v1630_v39  ;;  %1661 = vmatpush.bf16.xpose.msra.mxu2 %v1630_v39 }
  0x70   : > { %1043 = vmatpush.bf16.xpose.msra.mxu1 %v1646_v40  ;;  %1669 = vmatpush.bf16.xpose.msra.mxu3 %v1646_v40 }
  0x72   : > { %1138 = vperm.xlu2 %1701, %v1092_v41  }
  0x76   : > { %1148 = vperm.xlu1 %1700, %v1094_v44   ;;  %1143 = vperm.xlu0 %1699, %v1093_v45  }
  0x77   : > { %1044 = vmatmul.bf16.vlgmr.msra.gmra.mxu1 %v1638_v42  ;;  %1064 = vmatmul.bf16.vlgmr.msra.gmra.mxu3 %v1642_v43 }
  0x78   : > { %735 = vmatmul.bf16.vlgmr.msra.gmra.mxu0 %v1622_v46  ;;  %755 = vmatmul.bf16.vlgmr.msra.gmra.mxu2 %v1626_v47 }
  0x7a   : > { %1153 = vperm.xlu2 %1701, %v1095_v48  }
  0x7e   : > { %1163 = vperm.xlu1 %1700, %v1097_v49   ;;  %1158 = vperm.xlu0 %1699, %v1096_v50  }
  0x82   : > { %1168 = vperm.xlu2 %1701, %v1098_v51  }
  0x86   : > { %1178 = vperm.xlu1 %1700, %v1100_v54   ;;  %1173 = vperm.xlu0 %1699, %v1099_v55  }
  0x87   : > { %1049 = vmatmul.bf16.gmra.mxu1 %v1639_v52  ;;  %1069 = vmatmul.bf16.gmra.mxu3 %v1643_v53 }
  0x88   : > { %740 = vmatmul.bf16.gmra.mxu0 %v1623_v56  ;;  %760 = vmatmul.bf16.gmra.mxu2 %v1627_v57 }
  0x94   : > { %v2037_v6 = vpop.permute.xlu2 %815 }
  0x97   : > { %1054 = vmatmul.bf16.gmra.mxu1 %v1640_v58  ;;  %1074 = vmatmul.bf16.gmra.mxu3 %v1644_v59 }
  0x98   : > { %745 = vmatmul.bf16.gmra.mxu0 %v1624_v60  ;;  %765 = vmatmul.bf16.gmra.mxu2 %v1628_v61 }
  0x9c   : > { %v2043_v11 = vpop.permute.xlu2 %820 }
  0xa4   : > { %v2045_v13 = vpop.permute.xlu2 %835 }
  0xa7   : > { %1059 = vmatmul.bf16.gmra.mxu1 %v1641_v62  ;;  %1079 = vmatmul.bf16.gmra.mxu3 %v1645_v63 }
  0xa8   : > { %750 = vmatmul.bf16.gmra.mxu0 %v1625_v0  ;;  %770 = vmatmul.bf16.gmra.mxu2 %v1629_v1  ;;  %v806_v2 = vpop.permute.xlu1 %805  ;;  %v796_v12 = vpop.permute.xlu0 %795 }
  0xa9   : > { %v876_v19 = vadd.f32 %v2035_v5, %v796_v12  ;;  %v878_v45 = vadd.f32 %v2035_v5, %v806_v2 }
  0xac   : > { %v2047_v15 = vpop.permute.xlu2 %850 }
  0xb0   : > { %v811_v3 = vpop.permute.xlu1 %810  ;;  %v801_v14 = vpop.permute.xlu0 %800 }
  0xb1   : > { %v877_v30 = vadd.f32 %v2035_v5, %v801_v14  ;;  %v879_v59 = vadd.f32 %v2035_v5, %v811_v3 }
  0xb4   : > { %v2051_v17 = vpop.permute.xlu2 %865 }
  0xb8   : > { %v2028_v4 = vpop.permute.xlu1 %830  ;;  %v2049_v16 = vpop.permute.xlu0 %825 }
  0xbc   : > { %v1109_v20 = vpop.permute.xlu2 %1108 }
  0xc0   : > { %v846_v7 = vpop.permute.xlu1 %845  ;;  %v2053_v18 = vpop.permute.xlu0 %840 }
  0xc1   : > { %v886_v8 = vadd.f32 %v2035_v5, %v846_v7 }
  0xc4   : > { %v2070_v31 = vpop.permute.xlu2 %1123 }
  0xc8   : > { %v861_v9 = vpop.permute.xlu1 %860  ;;  %v2056_v21 = vpop.permute.xlu0 %855 }
  0xc9   : > { %v2041_v10 = vadd.f32 %v2035_v5, %v861_v9 }
  0xcc   : > { %v2080_v49 = vpop.permute.xlu2 %1138 }
  0xd0   : > { %v1104_v25 = vpop.permute.xlu1 %1103  ;;  %v2072_v35 = vpop.permute.xlu0 %870 }
  0xd4   : > { %v1154_v9 = vpop.permute.xlu2 %1153 }
  0xd8   : > { %v1119_v40 = vpop.permute.xlu1 %1118  ;;  %v1114_v53 = vpop.permute.xlu0 %1113 }
  0xe0   : > { %v2084_v60 = vpop.permute.xlu1 %1133 }
  0xf4   : > { %v1045_v22 = vpop.f32.mrf.mxu1 }
  0xf5   : > { %v736_v23 = vpop.f32.mrf.mxu0  ;;  %v1181_v27 = vmul.f32 %v1104_v25, %v1045_v22 }
  0xf6   : > { %v892_v24 = vsub.f32 %v876_v19, %v736_v23  ;;  %v1129_v19 = vpop.permute.xlu0 %1128 }
  0xf7   : > { %v1201_v38 = vmul.f32 %v2065_v28, %v1181_v27 }
  0xf8   : > { %1704 = vrcp.f32 %v892_v24  ;;  %v880_v24 = vadd.f32 %v2035_v5, %v2037_v6  ;;  %v884_v6 = vadd.f32 %v2035_v5, %v2045_v13 }
  0xfa   : > { %v2058_v26 = vpop.f32.mrf.mxu3 }
  0xfb   : > { %v2067_v29 = vpop.f32.mrf.mxu2 }
  0xfc   : > { %v1047_v32 = vpop.f32.mrf.mxu1 }
  0xfd   : > { %v738_v33 = vpop.f32.mrf.mxu0  ;;  %v1182_v42 = vmul.f32 %v1109_v20, %v1047_v32 }
  0xfe   : > { %v1705_v34 = vpop.eup %1704  ;;  %v893_v36 = vsub.f32 %v877_v30, %v738_v33 }
  0xff   : > { %v1233_v37 = vmul.f32 %v1705_v34, %v736_v23  ;;  %v1202_v52 = vmul.f32 %v2065_v28, %v1182_v42  ;;  %v2094_v34 = vpop.permute.xlu1 %1148  ;;  %v888_v42 = vadd.f32 %v2035_v5, %v2056_v21 }
 0x100   : > { %1706 = vrcp.f32 %v893_v36 }
 0x101   : > { %v1249_v39 = vsub.f32 %v1201_v38, %v1233_v37 }
 0x102   : > { %v2075_v41 = vpop.f32.mrf.mxu3 }
 0x103   : > { %v2077_v43 = vpop.f32.mrf.mxu2  ;;  %v1265_v44 = vmul.f32 %v1249_v39, %v1249_v39 }
 0x104   : > { %v1050_v46 = vpop.f32.mrf.mxu1 }
 0x105   : > { %1281 = vadd.xlane.f32.xlu2 %v1265_v44  ;;  %v741_v47 = vpop.f32.mrf.mxu0  ;;  %v1183_v56 = vmul.f32 %v1114_v53, %v1050_v46 }
 0x106   : > { %v1707_v48 = vpop.eup %1706  ;;  %v894_v50 = vsub.f32 %v878_v45, %v741_v47 }
 0x107   : > { %v1234_v51 = vmul.f32 %v1707_v48, %v738_v33  ;;  %v1203_v2 = vmul.f32 %v2065_v28, %v1183_v56  ;;  %v881_v48 = vadd.f32 %v2035_v5, %v2043_v11  ;;  %v885_v11 = vadd.f32 %v2035_v5, %v2053_v18 }
 0x108   : > { %1708 = vrcp.f32 %v894_v50  ;;  %v1144_v50 = vpop.permute.xlu0 %1143 }
 0x109   : > { %v1250_v54 = vsub.f32 %v1202_v52, %v1234_v51 }
 0x10a   : > { %v1070_v55 = vpop.f32.mrf.mxu3 }
 0x10b   : > { %v761_v57 = vpop.f32.mrf.mxu2  ;;  %v1266_v58 = vmul.f32 %v1250_v54, %v1250_v54  ;;  %v1191_v12 = vmul.f32 %v1154_v9, %v1070_v55  ;;  %v900_v55 = vsub.f32 %v884_v6, %v2067_v29  ;;  %v901_v9 = vsub.f32 %v885_v11, %v2077_v43 }
 0x10c   : > { %v902_v61 = vsub.f32 %v886_v8, %v761_v57  ;;  %v1052_v62 = vpop.f32.mrf.mxu1 }
 0x10d   : > { %1283 = vadd.xlane.f32.xlu0 %v1266_v58  ;;  %v743_v63 = vpop.f32.mrf.mxu0  ;;  %v1184_v3 = vmul.f32 %v1119_v40, %v1052_v62  ;;  %v1211_v30 = vmul.f32 %v2065_v28, %v1191_v12 }
 0x10e   : > { %v1709_v0 = vpop.eup %1708  ;;  %1710 = vrcp.f32 %v902_v61  ;;  %v895_v1 = vsub.f32 %v879_v59, %v743_v63 }
 0x10f   : > { %v1235_v7 = vmul.f32 %v1709_v0, %v741_v47  ;;  %v1204_v37 = vmul.f32 %v2065_v28, %v1184_v3 }
 0x110   : > { %1712 = vrcp.f32 %v895_v1  ;;  %v882_v1 = vadd.f32 %v2035_v5, %v2049_v16 }
 0x111   : > { %v1251_v14 = vsub.f32 %v1203_v2, %v1235_v7  ;;  %v887_v2 = vadd.f32 %v2035_v5, %v2047_v15 }
 0x112   : > { %v2087_v20 = vpop.f32.mrf.mxu3 }
 0x113   : > { %v2089_v22 = vpop.f32.mrf.mxu2  ;;  %v1267_v8 = vmul.f32 %v1251_v14, %v1251_v14 }
 0x114   : > { %v1711_v23 = vpop.eup %1710  ;;  %v1055_v25 = vpop.f32.mrf.mxu1 }
 0x115   : > { %v1243_v27 = vmul.f32 %v1711_v23, %v761_v57  ;;  %1285 = vadd.xlane.f32.xlu1 %v1267_v8  ;;  %v746_v32 = vpop.f32.mrf.mxu0  ;;  %v1185_v45 = vmul.f32 %v2070_v31, %v1055_v25  ;;  %v1164_v57 = vpop.permute.xlu1 %1163  ;;  %v903_v8 = vsub.f32 %v887_v2, %v2089_v22 }
 0x116   : > { %v1713_v33 = vpop.eup %1712  ;;  %v896_v36 = vsub.f32 %v880_v24, %v746_v32 }
 0x117   : > { %v1236_v38 = vmul.f32 %v1713_v33, %v743_v63  ;;  %v2097_v39 = vsub.f32 %v1211_v30, %v1243_v27  ;;  %v1205_v21 = vmul.f32 %v2065_v28, %v1185_v45  ;;  %v1169_v27 = vpop.permute.xlu2 %1168  ;;  %v1189_v30 = vmul.f32 %v1144_v50, %v2058_v26 }
 0x118   : > { %1714 = vrcp.f32 %v896_v36  ;;  %v890_v36 = vadd.f32 %v2035_v5, %v2051_v17 }
 0x119   : > { %v1252_v40 = vsub.f32 %v1204_v37, %v1236_v38  ;;  %v1209_v26 = vmul.f32 %v2065_v28, %v1189_v30 }
 0x11a   : > { %v1075_v44 = vpop.f32.mrf.mxu3 }
 0x11b   : > { %v766_v46 = vpop.f32.mrf.mxu2  ;;  %v1268_v47 = vmul.f32 %v1252_v40, %v1252_v40  ;;  %v1193_v31 = vmul.f32 %v1164_v57, %v1075_v44  ;;  %v883_v44 = vadd.f32 %v2035_v5, %v2028_v4 }
 0x11c   : > { %v904_v51 = vsub.f32 %v888_v42, %v766_v46  ;;  %v1057_v52 = vpop.f32.mrf.mxu1 }
 0x11d   : > { %1287 = vadd.xlane.f32.xlu2 %v1268_v47  ;;  %v748_v53 = vpop.f32.mrf.mxu0  ;;  %v1186_v61 = vmul.f32 %v1129_v19, %v1057_v52  ;;  %v1213_v14 = vmul.f32 %v2065_v28, %v1193_v31  ;;  %v1159_v19 = vpop.permute.xlu0 %1158 }
 0x11e   : > { %v1715_v54 = vpop.eup %1714  ;;  %1716 = vrcp.f32 %v904_v51  ;;  %v897_v13 = vsub.f32 %v881_v48, %v748_v53 }
 0x11f   : > { %v1237_v56 = vmul.f32 %v1715_v54, %v746_v32  ;;  %v1206_v16 = vmul.f32 %v2065_v28, %v1186_v61 }
 0x120   : > { %1718 = vrcp.f32 %v897_v13  ;;  %v1190_v13 = vmul.f32 %v2094_v34, %v2075_v41 }
 0x121   : > { %v1253_v58 = vsub.f32 %v1205_v21, %v1237_v56  ;;  %1720 = vrcp.f32 %v900_v55  ;;  %v1192_v56 = vmul.f32 %v1159_v19, %v2087_v20 }
 0x122   : > { %v1077_v59 = vpop.f32.mrf.mxu3  ;;  %v1210_v41 = vmul.f32 %v2065_v28, %v1190_v13 }
 0x123   : > { %v768_v62 = vpop.f32.mrf.mxu2  ;;  %v1269_v63 = vmul.f32 %v1253_v58, %v1253_v58  ;;  %v1194_v32 = vmul.f32 %v1169_v27, %v1077_v59  ;;  %v891_v58 = vadd.f32 %v2035_v5, %v2072_v35  ;;  %v1212_v20 = vmul.f32 %v2065_v28, %v1192_v56 }
 0x124   : > { %v1717_v0 = vpop.eup %1716  ;;  %v905_v7 = vsub.f32 %v2041_v10, %v768_v62  ;;  %v1060_v23 = vpop.f32.mrf.mxu1 }
 0x125   : > { %v1245_v12 = vmul.f32 %v1717_v0, %v766_v46  ;;  %1289 = vadd.xlane.f32.xlu2 %v1269_v63  ;;  %v751_v3 = vpop.f32.mrf.mxu0  ;;  %v1187_v38 = vmul.f32 %v2084_v60, %v1060_v23  ;;  %v1214_v48 = vmul.f32 %v2065_v28, %v1194_v32  ;;  %v1174_v4 = vpop.permute.xlu0 %1173  ;;  %v1275_v32 = vmul.f32 %v2097_v39, %v2097_v39 }
 0x126   : > { %v1719_v18 = vpop.eup %1718  ;;  %1722 = vrcp.f32 %v905_v7  ;;  %v898_v24 = vsub.f32 %v882_v1, %v751_v3 }
 0x127   : > { %v1238_v25 = vmul.f32 %v1719_v18, %v748_v53  ;;  %v2119_v15 = vsub.f32 %v1213_v14, %v1245_v12  ;;  %v1721_v10 = vpop.eup %1720  ;;  %v1207_v60 = vmul.f32 %v2065_v28, %v1187_v38  ;;  %v1179_v14 = vpop.permute.xlu1 %1178 }
 0x128   : > { %1724 = vrcp.f32 %v898_v24  ;;  %v1241_v37 = vmul.f32 %v1721_v10, %v2067_v29 }
 0x129   : > { %1726 = vrcp.f32 %v901_v9  ;;  %v1254_v33 = vsub.f32 %v1206_v16, %v1238_v25  ;;  %v1277_v30 = vmul.f32 %v2119_v15, %v2119_v15 }
 0x12a   : > { %1728 = vrcp.f32 %v903_v8  ;;  %v1080_v46 = vpop.f32.mrf.mxu3  ;;  %v1257_v53 = vsub.f32 %v1209_v26, %v1241_v37 }
 0x12b   : > { %v771_v40 = vpop.f32.mrf.mxu2  ;;  %v1270_v6 = vmul.f32 %v1254_v33, %v1254_v33  ;;  %v1195_v57 = vmul.f32 %v1174_v4, %v1080_v46 }
 0x12c   : > { %v1723_v42 = vpop.eup %1722  ;;  %v906_v45 = vsub.f32 %v890_v36, %v771_v40  ;;  %v1062_v21 = vpop.f32.mrf.mxu1  ;;  %v1273_v63 = vmul.f32 %v1257_v53, %v1257_v53 }
 0x12d   : > { %v1246_v47 = vmul.f32 %v1723_v42, %v768_v62  ;;  %1291 = vadd.xlane.f32.xlu0 %v1270_v6  ;;  %v753_v17 = vpop.f32.mrf.mxu0  ;;  %v1188_v61 = vmul.f32 %v2080_v49, %v1062_v21  ;;  %v1215_v7 = vmul.f32 %v2065_v28, %v1195_v57 }
 0x12e   : > { %v1725_v50 = vpop.eup %1724  ;;  %1730 = vrcp.f32 %v906_v45  ;;  %v899_v29 = vsub.f32 %v883_v44, %v753_v17 }
 0x12f   : > { %v1727_v51 = vpop.eup %1726  ;;  %v1239_v52 = vmul.f32 %v1725_v50, %v751_v3  ;;  %v1262_v54 = vsub.f32 %v1214_v48, %v1246_v47  ;;  %v1208_v49 = vmul.f32 %v2065_v28, %v1188_v61 }
 0x130   : > { %v1729_v55 = vpop.eup %1728  ;;  %1732 = vrcp.f32 %v899_v29  ;;  %v1242_v59 = vmul.f32 %v1727_v51, %v2077_v43 }
 0x131   : > { %v1255_v31 = vsub.f32 %v1207_v60, %v1239_v52  ;;  %v1244_v11 = vmul.f32 %v1729_v55, %v2089_v22  ;;  %v1278_v36 = vmul.f32 %v1262_v54, %v1262_v54 }
 0x132   : > { %v1082_v35 = vpop.f32.mrf.mxu3  ;;  %v1258_v43 = vsub.f32 %v1210_v41, %v1242_v59 }
 0x133   : > { %v773_v62 = vpop.f32.mrf.mxu2  ;;  %v1271_v0 = vmul.f32 %v1255_v31, %v1255_v31  ;;  %v1260_v9 = vsub.f32 %v1212_v20, %v1244_v11  ;;  %v1196_v3 = vmul.f32 %v1179_v14, %v1082_v35 }
 0x134   : > { %v1731_v1 = vpop.eup %1730  ;;  %v907_v34 = vsub.f32 %v891_v58, %v773_v62  ;;  %v1274_v8 = vmul.f32 %v1258_v43, %v1258_v43 }
 0x135   : > { %v1247_v2 = vmul.f32 %v1731_v1, %v771_v40  ;;  %1297 = vadd.xlane.f32.xlu0 %v1273_v63  ;;  %1293 = vadd.xlane.f32.xlu1 %v1271_v0  ;;  %v1276_v19 = vmul.f32 %v1260_v9, %v1260_v9  ;;  %v1216_v25 = vmul.f32 %v2065_v28, %v1196_v3  ;;  %v1336_v1 = vstv %s1314_s21 }
 0x136   : > { %v1733_v5 = vpop.eup %1732  ;;  %1734 = vrcp.f32 %v907_v34  ;;  %v1313_v34 = vld [vmem:[%s1953_s26] sm:$0x1] }
 0x137   : > { %v1240_v22 = vmul.f32 %v1733_v5, %v753_v17  ;;  %v1263_v12 = vsub.f32 %v1215_v7, %v1247_v2 }
 0x139   : > { %v1256_v18 = vsub.f32 %v1208_v49, %v1240_v22  ;;  %v1279_v27 = vmul.f32 %v1263_v12, %v1263_v12 }
 0x13b   : > { %v1272_v23 = vmul.f32 %v1256_v18, %v1256_v18 }
 0x13c   : > { %v1735_v24 = vpop.eup %1734 }
 0x13d   : > { %v1248_v16 = vmul.f32 %v1735_v24, %v773_v62  ;;  %1303 = vadd.xlane.f32.xlu0 %v1276_v19  ;;  %1299 = vadd.xlane.f32.xlu1 %v1274_v8 }
 0x13e   : > { %1295 = vadd.xlane.f32.xlu2 %v1272_v23 }
 0x13f   : > { %v1264_v10 = vsub.f32 %v1216_v25, %v1248_v16 }
 0x141   : > { %v1280_v33 = vmul.f32 %v1264_v10, %v1264_v10 }
 0x145   : > { %1309 = vadd.xlane.f32.xlu0 %v1279_v27  ;;  %1305 = vadd.xlane.f32.xlu1 %v1277_v30 }
 0x146   : > { %1301 = vadd.xlane.f32.xlu2 %v1275_v32 }
 0x14d   : > { %1311 = vadd.xlane.f32.xlu1 %v1280_v33 }
 0x14e   : > { %1307 = vadd.xlane.f32.xlu2 %v1278_v36 }
 0x178   : > { %v1282_v37 = vpop.xlane.xlu2 %1281 }
 0x180   : > { %v1284_v28 = vpop.xlane.xlu0 %1283 }
 0x181   : > { %v1315_v42 = vadd.f32 %v1284_v28, %v1282_v37 }
 0x188   : > { %v1286_v40 = vpop.xlane.xlu1 %1285 }
 0x189   : > { %v1316_v44 = vadd.f32 %v1315_v42, %v1286_v40 }
 0x190   : > { %v1288_v38 = vpop.xlane.xlu2 %1287 }
 0x191   : > { %v1317_v15 = vadd.f32 %v1316_v44, %v1288_v38 }
 0x198   : > { %v1290_v46 = vpop.xlane.xlu2 %1289 }
 0x199   : > { %v1318_v26 = vadd.f32 %v1317_v15, %v1290_v46 }
 0x1a0   : > { %v1292_v6 = vpop.xlane.xlu0 %1291 }
 0x1a1   : > { %v1319_v47 = vadd.f32 %v1318_v26, %v1292_v6 }
 0x1a8   : > { %v1294_v45 = vpop.xlane.xlu1 %1293  ;;  %v1298_v39 = vpop.xlane.xlu0 %1297 }
 0x1a9   : > { %v1320_v48 = vadd.f32 %v1319_v47, %v1294_v45 }
 0x1b0   : > { %v1300_v17 = vpop.xlane.xlu1 %1299  ;;  %v1304_v52 = vpop.xlane.xlu0 %1303 }
 0x1b1   : > { %v1296_v50 = vpop.xlane.xlu2 %1295 }
 0x1b2   : > { %v1321_v29 = vadd.f32 %v1320_v48, %v1296_v50 }
 0x1b4   : > { %v1322_v51 = vadd.f32 %v1321_v29, %v1298_v39 }
 0x1b6   : > { %v1323_v60 = vadd.f32 %v1322_v51, %v1300_v17 }
 0x1b8   : > { %v1306_v55 = vpop.xlane.xlu1 %1305  ;;  %v1310_v57 = vpop.xlane.xlu0 %1309 }
 0x1b9   : > { %v1302_v53 = vpop.xlane.xlu2 %1301 }
 0x1ba   : > { %v1324_v54 = vadd.f32 %v1323_v60, %v1302_v53 }
 0x1bc   : > { %v1325_v4 = vadd.f32 %v1324_v54, %v1304_v52 }
 0x1be   : > { %v1326_v13 = vadd.f32 %v1325_v4, %v1306_v55 }
 0x1c0   : > { %v1312_v58 = vpop.xlane.xlu1 %1311 }
 0x1c1   : > { %v1308_v21 = vpop.xlane.xlu2 %1307 }
 0x1c2   : > { %v1327_v56 = vadd.f32 %v1326_v13, %v1308_v21 }
 0x1c4   : > { %v1328_v31 = vadd.f32 %v1327_v56, %v1310_v57 }
 0x1c6   : > { %v1329_v59 = vadd.f32 %v1328_v31, %v1312_v58 }
 0x1c8   : > { %v1330_v11 = vrot.slane %v1329_v59, 4 }
 0x1ca   : > { %v1331_v61 = vadd.f32 %v1330_v11, %v1329_v59 }
 0x1cc   : > { %v1332_v62 = vrot.slane %v1331_v61, 2 }
 0x1ce   : > { %v1333_v63 = vadd.f32 %v1332_v62, %v1331_v61 }
 0x1d0   : > { %v1334_v0 = vrot.slane %v1333_v63, 1 }
 0x1d2   : > { %v1335_v41 = vadd.f32 %v1334_v0, %v1333_v63 }
 0x1d4   : > { %v1337_v20 = vmul.f32 %v1336_v1, %v1335_v41 }
 0x1d6   : > { %v1338_v2 = vadd.f32 %v1337_v20, %v1313_v34 }
 0x1d8   : > { %1340 = vst.msk [vmem:[%s1953_s26] sm:$0x1] %vm591_vm0, %v1338_v2 }
 0x1d9 PF: > { %s39_s1 = sadd.s32 1, %s1796_s1   ;;  %s2174_s15 = sld [smem:[#allocation7_spill]] }
 0x1da   : > { %p36_p0 = scmp.ge.s32.totalorder %s39_s1, 4   ;;  %s2175_s0 = smov %s1792_s29 }
 0x1dc   :  { %38 = sbr.rel (!%p36_p0) target bundleno = 11 (0xb), region = 111 }
 0x1df   : > { %s2176_s29 = smov %s2174_s15 }

</bundles_post_ra>
